<compile_context>
chip_gen: v6e
topology: v6e:2x2x1
jax: 0.10.0
libtpu: 0.0.40
codegen_flags: <defaults>
</compile_context>

<pallas_src>
import functools

import jax
import jax.numpy as jnp
from jax import lax
from jax.experimental import pallas as pl
from jax.experimental.pallas import tpu as pltpu

EPS = 1e-5  # PyTorch nn.LayerNorm default


def _prenorm_kernel(x_ref, gamma_ref, beta_ref, w_ref, b_ref, o_ref, *, d_orig, d_pad):
    # x_ref: (TM, Dp)  gamma/beta/b: (1, Dp) f32  w: (Dp, Dp) bf16  o: (TM, Dp)
    x = x_ref[...].astype(jnp.float32)
    inv_d = jnp.float32(1.0 / d_orig)

    # ---- LayerNorm statistics over the original feature width (f32) ----
    # Padded columns of x are zero, so the sum over Dp equals the sum over D.
    mean = jnp.sum(x, axis=-1, keepdims=True) * inv_d
    centered = x - mean
    if d_orig != d_pad:
        lane = lax.broadcasted_iota(jnp.int32, x.shape, dimension=1)
        mask = (lane < d_orig).astype(jnp.float32)
        var = jnp.sum(centered * centered * mask, axis=-1, keepdims=True) * inv_d
    else:
        var = jnp.sum(centered * centered, axis=-1, keepdims=True) * inv_d
    inv_std = lax.rsqrt(var + EPS)

    # gamma/beta are zero in padded columns -> y is zero there.
    y = centered * inv_std * gamma_ref[...] + beta_ref[...]

    # ---- fn = Linear(dim, dim): bf16 operands, f32 accumulation on the MXU ----
    out = jnp.dot(y.astype(jnp.bfloat16), w_ref[...],
                  preferred_element_type=jnp.float32)
    out = out + b_ref[...]

    o_ref[...] = out.astype(o_ref.dtype)


def prenorm(x, gamma, beta, w, b, *, tm=None):
    """x: (B, S, D). Returns fn(LayerNorm(x)) with fn = Linear(D, D) = x @ w + b."""
    B, S, D = x.shape
    R = B * S

    # Lane-dense feature dim: pad D up to a multiple of 128.
    Dp = pl.cdiv(D, 128) * 128
    # Row tile: multiple of 8, VMEM-budgeted (512 rows is safe on v7x's 64 MiB
    # for Dp up to ~2K f32 with double-buffered in/out + resident bf16 weight).
    R8 = pl.cdiv(R, 8) * 8
    if tm is None:
        TM = 512 if R8 >= 512 else R8
    else:
        TM = tm
    Rp = pl.cdiv(R8, TM) * TM

    x2d = jnp.pad(x.reshape(R, D), ((0, Rp - R), (0, Dp - D)))
    gamma_p = jnp.pad(gamma.astype(jnp.float32), (0, Dp - D)).reshape(1, Dp)
    beta_p = jnp.pad(beta.astype(jnp.float32), (0, Dp - D)).reshape(1, Dp)
    b_p = jnp.pad(b.astype(jnp.float32), (0, Dp - D)).reshape(1, Dp)
    w_p = jnp.pad(w, ((0, Dp - D), (0, Dp - D))).astype(jnp.bfloat16)

    x_bytes = x2d.dtype.itemsize
    out_bytes = jnp.dtype(x.dtype).itemsize
    # VMEM budget: double-buffered x tile + double-buffered out tile +
    # resident bf16 weight + params, with slack; keep under v7x's 64 MiB.
    need = (2 * TM * Dp * x_bytes + 2 * TM * Dp * out_bytes
            + Dp * Dp * 2 + 3 * Dp * 4)
    vmem_limit = int(min(2 * need + (4 << 20), 60 << 20))

    cost = pl.CostEstimate(
        flops=2 * Rp * Dp * Dp,
        transcendentals=0,
        bytes_accessed=Rp * Dp * (x_bytes + out_bytes) + Dp * Dp * 2 + 3 * Dp * 4,
    )

    kernel = functools.partial(_prenorm_kernel, d_orig=D, d_pad=Dp)

    out = pl.pallas_call(
        kernel,
        out_shape=jax.ShapeDtypeStruct((Rp, Dp), x.dtype),
        grid_spec=pltpu.PrefetchScalarGridSpec(
            num_scalar_prefetch=0,
            grid=(Rp // TM,),
            in_specs=[
                pl.BlockSpec((TM, Dp), lambda i: (i, 0)),   # x rows (pipelined)
                pl.BlockSpec((1, Dp), lambda i: (0, 0)),    # gamma (resident)
                pl.BlockSpec((1, Dp), lambda i: (0, 0)),    # beta  (resident)
                pl.BlockSpec((Dp, Dp), lambda i: (0, 0)),   # fn weight (resident)
                pl.BlockSpec((1, Dp), lambda i: (0, 0)),    # fn bias (resident)
            ],
            out_specs=pl.BlockSpec((TM, Dp), lambda i: (i, 0)),
        ),
        compiler_params=pltpu.CompilerParams(
            dimension_semantics=("parallel",),
            vmem_limit_bytes=vmem_limit,
        ),
        cost_estimate=cost,
    )(x2d, gamma_p, beta_p, w_p, b_p)

    return out[:R, :D].reshape(B, S, D)


def prenorm_reference(x, gamma, beta, w, b):
    """Pure-JAX f32 reference mirroring PyTorch LayerNorm + Linear semantics."""
    mean = jnp.mean(x, axis=-1, keepdims=True)
    var = jnp.mean((x - mean) ** 2, axis=-1, keepdims=True)
    xn = (x - mean) / jnp.sqrt(var + EPS)
    y = xn * gamma + beta
    return jnp.einsum("bsd,de->bse", y, w) + b


if __name__ == "__main__":
    B, S, D = 2, 8, 32

    key = jax.random.PRNGKey(0)
    kx, kw, kb = jax.random.split(key, 3)

    x = jax.random.normal(kx, (B, S, D), dtype=jnp.float32)

    # LayerNorm params: PyTorch defaults (gamma=1, beta=0).
    gamma = jnp.ones((D,), dtype=jnp.float32)
    beta = jnp.zeros((D,), dtype=jnp.float32)

    # fn = Linear(D, D), deterministic synthetic init.
    w = jax.random.normal(kw, (D, D), dtype=jnp.float32) * (1.0 / jnp.sqrt(D))
    b = jax.random.normal(kb, (D,), dtype=jnp.float32) * 0.01

    out = prenorm(x, gamma, beta, w, b)
    out = jax.block_until_ready(out)

    ref = prenorm_reference(x, gamma, beta, w, b)
    assert out.shape == (B, S, D)
    # Tolerance deliberately loosened: the fn matmul runs with bf16 operands
    # (f32 accumulation) on the MXU, ~1e-2-level divergence vs the f32 reference.
    assert jnp.allclose(out, ref, atol=2e-2, rtol=2e-2), "mismatch vs reference"

    print("KERNEL_OK")
</pallas_src>

<mosaic_0001>
module attributes {stable_mosaic.version = 11 : i64} {
  func.func @_prenorm_kernel(%arg0: i32, %arg1: memref<16x128xf32, #tpu.memory_space<vmem>>, %arg2: memref<1x128xf32, #tpu.memory_space<vmem>>, %arg3: memref<1x128xf32, #tpu.memory_space<vmem>>, %arg4: memref<128x128xbf16, #tpu.memory_space<vmem>>, %arg5: memref<1x128xf32, #tpu.memory_space<vmem>>, %arg6: memref<16x128xf32, #tpu.memory_space<vmem>>) attributes {dimension_semantics = [#tpu.dimension_semantics<parallel>], iteration_bounds = array<i64: 1>, scalar_prefetch = 0 : i64, scratch_operands = 0 : i64, tpu.core_type = #tpu.core_type<tc>, window_params = [{transform_indices = @transform_0, window_bounds = array<i64: 16, 128>}, {pipeline_mode = #tpu.pipeline_mode<synchronous>, transform_indices = @transform_1, window_bounds = array<i64: 1, 128>}, {pipeline_mode = #tpu.pipeline_mode<synchronous>, transform_indices = @transform_2, window_bounds = array<i64: 1, 128>}, {pipeline_mode = #tpu.pipeline_mode<synchronous>, transform_indices = @transform_3, window_bounds = array<i64: 128, 128>}, {pipeline_mode = #tpu.pipeline_mode<synchronous>, transform_indices = @transform_4, window_bounds = array<i64: 1, 128>}, {transform_indices = @transform_5, window_bounds = array<i64: 16, 128>}]} {
    %c0 = arith.constant 0 : index
    %c0_0 = arith.constant 0 : index
    %0 = vector.load %arg1[%c0, %c0_0] : memref<16x128xf32, #tpu.memory_space<vmem>>, vector<16x128xf32>
    %cst = arith.constant dense<0.000000e+00> : vector<16xf32>
    %1 = vector.multi_reduction <add>, %0, %cst [1] : vector<16x128xf32> to vector<16xf32>
    %2 = vector.shape_cast %1 : vector<16xf32> to vector<16x1xf32>
    %cst_1 = arith.constant 3.125000e-02 : f32
    %3 = vector.broadcast %cst_1 : f32 to vector<16x1xf32>
    %4 = arith.mulf %2, %3 : vector<16x1xf32>
    %5 = vector.broadcast %4 : vector<16x1xf32> to vector<16x128xf32>
    %6 = arith.subf %0, %5 : vector<16x128xf32>
    %7 = tpu.iota {dimensions = array<i32: 1>} : vector<16x128xi32>
    %c32_i32 = arith.constant 32 : i32
    %8 = vector.broadcast %c32_i32 : i32 to vector<16x128xi32>
    %9 = arith.cmpi slt, %7, %8 : vector<16x128xi32>
    %10 = arith.extui %9 : vector<16x128xi1> to vector<16x128xi32>
    %11 = arith.sitofp %10 : vector<16x128xi32> to vector<16x128xf32>
    %12 = arith.mulf %6, %6 : vector<16x128xf32>
    %13 = arith.mulf %12, %11 : vector<16x128xf32>
    %cst_2 = arith.constant dense<0.000000e+00> : vector<16xf32>
    %14 = vector.multi_reduction <add>, %13, %cst_2 [1] : vector<16x128xf32> to vector<16xf32>
    %15 = vector.shape_cast %14 : vector<16xf32> to vector<16x1xf32>
    %cst_3 = arith.constant 3.125000e-02 : f32
    %16 = vector.broadcast %cst_3 : f32 to vector<16x1xf32>
    %17 = arith.mulf %15, %16 : vector<16x1xf32>
    %cst_4 = arith.constant 9.99999974E-6 : f32
    %18 = vector.broadcast %cst_4 : f32 to vector<16x1xf32>
    %19 = arith.addf %17, %18 : vector<16x1xf32>
    %20 = math.rsqrt %19 : vector<16x1xf32>
    %21 = vector.broadcast %20 : vector<16x1xf32> to vector<16x128xf32>
    %22 = arith.mulf %6, %21 : vector<16x128xf32>
    %c0_5 = arith.constant 0 : index
    %c0_6 = arith.constant 0 : index
    %23 = vector.load %arg2[%c0_5, %c0_6] : memref<1x128xf32, #tpu.memory_space<vmem>>, vector<1x128xf32>
    %24 = vector.broadcast %23 : vector<1x128xf32> to vector<16x128xf32>
    %25 = arith.mulf %22, %24 : vector<16x128xf32>
    %c0_7 = arith.constant 0 : index
    %c0_8 = arith.constant 0 : index
    %26 = vector.load %arg3[%c0_7, %c0_8] : memref<1x128xf32, #tpu.memory_space<vmem>>, vector<1x128xf32>
    %27 = vector.broadcast %26 : vector<1x128xf32> to vector<16x128xf32>
    %28 = arith.addf %25, %27 : vector<16x128xf32>
    %29 = arith.truncf %28 : vector<16x128xf32> to vector<16x128xbf16>
    %c0_9 = arith.constant 0 : index
    %c0_10 = arith.constant 0 : index
    %30 = vector.load %arg4[%c0_9, %c0_10] : memref<128x128xbf16, #tpu.memory_space<vmem>>, vector<128x128xbf16>
    %cst_11 = arith.constant dense<0.000000e+00> : vector<16x128xf32>
    %31 = tpu.matmul %29, %30, %cst_11 {dimension_numbers = #tpu.dot_dimension_numbers<[1], [0], [0], [1], [0, 0, 1, 1], [], []>} : vector<16x128xbf16>, vector<128x128xbf16>, vector<16x128xf32> -> vector<16x128xf32>
    %c0_12 = arith.constant 0 : index
    %c0_13 = arith.constant 0 : index
    %32 = vector.load %arg5[%c0_12, %c0_13] : memref<1x128xf32, #tpu.memory_space<vmem>>, vector<1x128xf32>
    %33 = vector.broadcast %32 : vector<1x128xf32> to vector<16x128xf32>
    %34 = arith.addf %31, %33 : vector<16x128xf32>
    %c0_14 = arith.constant 0 : index
    %c0_15 = arith.constant 0 : index
    %35 = vector.load %arg6[%c0_14, %c0_15] : memref<16x128xf32, #tpu.memory_space<vmem>>, vector<16x128xf32>
    tpu.vector_store %arg6[%c0_14, %c0_15], %34 {strides = array<i32>} : memref<16x128xf32, #tpu.memory_space<vmem>>, vector<16x128xf32>,
    return
  }
  func.func @transform_0(%arg0: i32) -> (i32, i32) {
    %c0_i32 = arith.constant 0 : i32
    %c0_i32_0 = arith.constant 0 : i32
    return %arg0, %c0_i32 : i32, i32
  }
  func.func @transform_1(%arg0: i32) -> (i32, i32) {
    %c0_i32 = arith.constant 0 : i32
    %c0_i32_0 = arith.constant 0 : i32
    %c0_i32_1 = arith.constant 0 : i32
    return %c0_i32, %c0_i32_0 : i32, i32
  }
  func.func @transform_2(%arg0: i32) -> (i32, i32) {
    %c0_i32 = arith.constant 0 : i32
    %c0_i32_0 = arith.constant 0 : i32
    %c0_i32_1 = arith.constant 0 : i32
    return %c0_i32, %c0_i32_0 : i32, i32
  }
  func.func @transform_3(%arg0: i32) -> (i32, i32) {
    %c0_i32 = arith.constant 0 : i32
    %c0_i32_0 = arith.constant 0 : i32
    %c0_i32_1 = arith.constant 0 : i32
    return %c0_i32, %c0_i32_0 : i32, i32
  }
  func.func @transform_4(%arg0: i32) -> (i32, i32) {
    %c0_i32 = arith.constant 0 : i32
    %c0_i32_0 = arith.constant 0 : i32
    %c0_i32_1 = arith.constant 0 : i32
    return %c0_i32, %c0_i32_0 : i32, i32
  }
  func.func @transform_5(%arg0: i32) -> (i32, i32) {
    %c0_i32 = arith.constant 0 : i32
    %c0_i32_0 = arith.constant 0 : i32
    return %arg0, %c0_i32 : i32, i32
  }
}

</mosaic_0001>

<bundles_post_ra>
// kernel: tpu_custom_call.1
= control target key start
LH: loop header
LB: loop body
LE: loop exit
PB: predicated region body
PF: predicated region fallthrough
CT: control target
= control target key end

     0   :  { %10 = vsyncpa [#allocation3], 0  ;;  %s423_s0 = inlined_call_operand.hbm [shape: f32[16,128], index: 0, kind: input, shape index: {}]   ;;  %s424_s1 = inlined_call_operand.vmem [shape: f32[1,128], index: 1, kind: input, shape index: {}]   ;;  %s425_s2 = inlined_call_operand.vmem [shape: f32[1,128], index: 2, kind: input, shape index: {}]   ;;  %s426_s3 = inlined_call_operand.hbm [shape: bf16[128,128], index: 3, kind: input, shape index: {}]   ;;  %s427_s4 = inlined_call_operand.vmem [shape: f32[1,128], index: 4, kind: input, shape index: {}]   ;;  %s428_s5 = inlined_call_operand.hbm [shape: f32[16,128], index: 5, kind: output, shape index: {}]  }
   0x1   :  { %11 = vsyncpa [#allocation6], 0 }
   0x2   :  { %12 = vsyncpa [#allocation4], 0  ;;  %s360_s18 = smov [#allocation2]  }
   0x3   :  { %s18_s19 = sshll.u32 %s360_s18, 4  ;;  %s19_s19 = int_to_ptr.vmem [resolvable:$true] %s18_s19 }
   0x4   :  { %s302_s20 = scalar_lea.vmem %s19_s19, 256  ;;  %p307_p1 = scmp.lt.s32.totalorder %s19_s19, %s19_s19 }
   0x5   :  { %p303_p0 = scmp.ne.s32.totalorder %s19_s19, %s302_s20  ;;  %p308_p2 = scmp.lt.s32.totalorder %s302_s20, %s302_s20 }
   0x7   :  { %p309_p3 = por %p308_p2, %p307_p1 }
   0x9   :  { %p310_p4 = pnand %p309_p3, %p303_p0 }
   0xb   :  { %313 = shalt.err (!%p310_p4)
}
   0xc   :  { %s361_s21 = smov 128   ;;  %s362_s22 = smov 8  }
   0xd   :  { %24 = dma.hbm_to_vmem [thread:$0]  %s423_s0, 256, %s19_s19, [#allocation3], %s361_s21, %s361_s21, %s362_s22  }
   0xe   :  { %s363_s25 = smov [#allocation5]  }
   0xf   :  { %s34_s26 = sshll.u32 %s363_s25, 4  ;;  %s35_s26 = int_to_ptr.vmem [resolvable:$true] %s34_s26 }
  0x10   :  { %s322_s27 = scalar_lea.vmem %s35_s26, 1024  ;;  %p327_p6 = scmp.lt.s32.totalorder %s35_s26, %s35_s26 }
  0x11   :  { %p323_p5 = scmp.ne.s32.totalorder %s35_s26, %s322_s27  ;;  %p328_p7 = scmp.lt.s32.totalorder %s322_s27, %s322_s27 }
  0x13   :  { %p329_p8 = por %p328_p7, %p327_p6 }
  0x15   :  { %p330_p9 = pnand %p329_p8, %p323_p5 }
  0x17   :  { %333 = shalt.err (!%p330_p9)
}
  0x18   :  { %s364_s28 = smov 64   ;;  %s365_s29 = smov 4  }
  0x19   :  { %40 = dma.hbm_to_vmem [thread:$0]  %s426_s3, 1024, %s35_s26, [#allocation6], %s364_s28, %s364_s28, %s365_s29  }
  0x1a   :  { %354 = dma.done.wait [#allocation3], 256  }
  0x1b   :  { %355 = vsyncadd [#allocation3], 4294967040 }
  0x1c   :  { %356 = dma.done.wait [#allocation6], 1024  }
  0x1d   :  { %357 = vsyncadd [#allocation6], 4294966272  ;;  %v50_v0 = vld [vmem:[#allocation2] sm:$0xff]  ;;  %v51_v1 = vld [vmem:[#allocation2 + $0x8] sm:$0xff]  ;;  %v366_v2 = vmov 0.0   ;;  %v60_v4 = vlaneseq  ;;  %vm367_vm1 = vmmov 0  }
  0x1e   :  { %52 = vadd.xlane.f32.xlu0 %v50_v0  ;;  %253 = vmatprep.subr.bf16.mxu0 %v366_v2  ;;  %v282_v3 = vld [vmem:[#allocation5 + $0x38] sm:$0xff]   ;;  %v283_v17 = vld [vmem:[#allocation5 + $0x30] sm:$0xff]   ;;  %v284_v18 = vld [vmem:[#allocation5 + $0x28] sm:$0xff]  }
  0x1f   :  { %254 = vmatpush3.bf16.msra.mxu0 %v282_v3  ;;  %v61_v5 = vand.u32 127, %v60_v4  ;;  %v285_v19 = vld [vmem:[#allocation5 + $0x20] sm:$0xff]   ;;  %269 = vmatprep.mubr.msk.bf16.mxu0 %vm367_vm1, %v366_v2  ;;  %v286_v20 = vld [vmem:[#allocation5 + $0x18] sm:$0xff]   ;;  %v287_v21 = vld [vmem:[#allocation5 + $0x10] sm:$0xff]  }
  0x20   :  { %255 = vmatprep.subr.bf16.mxu0 %v366_v2  ;;  %v288_v22 = vld [vmem:[#allocation5 + $0x8] sm:$0xff]   ;;  %v289_v23 = vld [vmem:[#allocation5] sm:$0xff]   ;;  %v233_v32 = vld [vmem:[%s424_s1] ss:$0 sm:$0xff]  ;;  %s368_s1 = smov [#allocation7]  }
  0x21   :  { %vm62_vm0 = vcmp.lt.s32.totalorder %v61_v5, 32  ;;  %v234_v36 = vld [vmem:[%s425_s2] ss:$0 sm:$0xff]  ;;  %s219_s11 = sshll.u32 %s368_s1, 4  ;;  %s220_s11 = int_to_ptr.vmem [resolvable:$true] %s219_s11 }
  0x22   :  { %54 = vadd.xlane.f32.xlu0 %v51_v1  ;;  %v232_v10 = vsel %vm62_vm0, 1.0, %v366_v2  ;;  %v235_v41 = vld [vmem:[%s427_s4] ss:$0 sm:$0xff]  ;;  %s334_s2 = scalar_lea.vmem %s220_s11, 256  ;;  %p339_p11 = scmp.lt.s32.totalorder %s220_s11, %s220_s11 }
  0x23   :  { %256 = vmatpush3.bf16.msra.mxu0 %v283_v17  ;;  %p335_p10 = scmp.ne.s32.totalorder %s220_s11, %s334_s2  ;;  %p340_p12 = scmp.lt.s32.totalorder %s334_s2, %s334_s2 }
  0x24   :  { %257 = vmatprep.subr.bf16.mxu0 %v366_v2 }
  0x25   :  { %p341_p13 = por %p340_p12, %p339_p11 }
  0x27   :  { %258 = vmatpush3.bf16.msra.mxu0 %v284_v18  ;;  %p342_p0 = pnand %p341_p13, %p335_p10 }
  0x28   :  { %259 = vmatprep.subr.bf16.mxu0 %v366_v2 }
  0x2b   :  { %260 = vmatpush3.bf16.msra.mxu0 %v285_v19 }
  0x2c   :  { %261 = vmatprep.subr.bf16.mxu0 %v366_v2 }
  0x2f   :  { %262 = vmatpush3.bf16.msra.mxu0 %v286_v20 }
  0x30   :  { %263 = vmatprep.subr.bf16.mxu0 %v366_v2 }
  0x33   :  { %264 = vmatpush3.bf16.msra.mxu0 %v287_v21 }
  0x34   :  { %265 = vmatprep.subr.bf16.mxu0 %v366_v2 }
  0x37   :  { %266 = vmatpush3.bf16.msra.mxu0 %v288_v22 }
  0x38   :  { %267 = vmatprep.subr.bf16.mxu0 %v366_v2 }
  0x3b   :  { %268 = vmatpush3.bf16.msra.mxu0 %v289_v23 }
  0xa7   :  { %v53_v6 = vpop.xlane.xlu0 %52 }
  0xa8   :  { %v56_v7 = vmul.f32 0.03125, %v53_v6 }
  0xaa   :  { %v58_v8 = vsub.f32 %v50_v0, %v56_v7 }
  0xab   :  { %v55_v9 = vpop.xlane.xlu0 %54 }
  0xac   :  { %v57_v11 = vmul.f32 0.03125, %v55_v9  ;;  %v65_v12 = vmul.f32 %v58_v8, %v58_v8 }
  0xae   :  { %v59_v13 = vsub.f32 %v51_v1, %v57_v11  ;;  %v67_v14 = vmul.f32 %v232_v10, %v65_v12 }
  0xb0   :  { %69 = vadd.xlane.f32.xlu1 %v67_v14  ;;  %v66_v15 = vmul.f32 %v59_v13, %v59_v13 }
  0xb2   :  { %v68_v16 = vmul.f32 %v232_v10, %v66_v15 }
  0xb4   :  { %71 = vadd.xlane.f32.xlu1 %v68_v16 }
 0x139   :  { %v70_v24 = vpop.xlane.xlu1 %69 }
 0x13a   :  { %v73_v25 = vmul.f32 0.03125, %v70_v24 }
 0x13c   :  { %v75_v26 = vadd.f32 1e-05, %v73_v25 }
 0x13d   :  { %v72_v27 = vpop.xlane.xlu1 %71 }
 0x13e   :  { %290 = vrsqrt.f32 %v75_v26  ;;  %v74_v28 = vmul.f32 0.03125, %v72_v27 }
 0x140   :  { %v76_v29 = vadd.f32 1e-05, %v74_v28 }
 0x142   :  { %292 = vrsqrt.f32 %v76_v29 }
 0x14b   :  { %v291_v30 = vpop.eup %290 }
 0x14c   :  { %v79_v31 = vmul.f32 %v291_v30, %v58_v8 }
 0x14e   :  { %v88_v35 = vmul.f32 %v233_v32, %v79_v31 }
 0x14f   :  { %v293_v33 = vpop.eup %292 }
 0x150   :  { %v80_v34 = vmul.f32 %v293_v33, %v59_v13  ;;  %v97_v38 = vadd.f32 %v234_v36, %v88_v35 }
 0x152   :  { %v89_v37 = vmul.f32 %v233_v32, %v80_v34 }
 0x154   :  { %v98_v39 = vadd.f32 %v234_v36, %v89_v37 }
 0x156   :  { %v99_v40 = vpack.c.bf16 %v98_v39, %v97_v38 }
 0x158   :  { %270 = vmatmul.mubr.bf16.vlgmr.msra.gmra.mxu0 %v99_v40 }
 0x218   :  { %v205_v42 = vpop.f32.mrf.mxu0 }
 0x219   :  { %v206_v43 = vadd.f32 %v235_v41, %v205_v42 }
 0x21a   :  { %v271_v44 = vpop.f32.mrf.mxu0 }
 0x21b   :  { %212 = vst [vmem:[#allocation7] sm:$0xff] %v206_v43 }
 0x21c   :  { %v208_v45 = vpop.f32.mrf.mxu0 }
 0x21d   :  { %v209_v46 = vadd.f32 %v235_v41, %v208_v45 }
 0x21e   :  { %v272_v47 = vpop.f32.mrf.mxu0 }
 0x21f   :  { %213 = vst [vmem:[#allocation7 + $0x8] sm:$0xff] %v209_v46 }
 0x220   :  { %345 = shalt.err (!%p342_p0)
}
 0x221   :  { %225 = dma.vmem_to_hbm [thread:$0]  %s220_s11, 256, %s428_s5, [#allocation4], %s361_s21, %s361_s21, %s362_s22  }
 0x222   :  { %358 = dma.done.wait [#allocation4], 256  }
 0x223   :  { %359 = vsyncadd [#allocation4], 4294967040 }
 0x224   :  { %229 = vsyncpa [#allocation3], 1 }
 0x225   :  { %230 = vsyncpa [#allocation6], 1 }
 0x226   :  { %231 = vsyncpa [#allocation4], 1 }

</bundles_post_ra>
